<compile_context>
chip_gen: v5e
topology: v5e:2x2
jax: 0.10.0
libtpu: 0.0.40
codegen_flags: <defaults>
</compile_context>

<pallas_src>
import functools
import math

import jax
import jax.numpy as jnp
from jax.experimental import pallas as pl
from jax.experimental.pallas import tpu as pltpu


# ----------------------------------------------------------------------------
# helpers
# ----------------------------------------------------------------------------
def _round_up(x, m):
    return ((x + m - 1) // m) * m


def _pad_axis(x, axis, target):
    if x.shape[axis] == target:
        return x
    pads = [(0, 0)] * x.ndim
    pads[axis] = (0, target - x.shape[axis])
    return jnp.pad(x, pads)


def _sigmoid(x):
    # numerically safe sigmoid via tanh (EUP-friendly, no inf intermediate)
    return 0.5 * (jnp.tanh(0.5 * x) + 1.0)


# ----------------------------------------------------------------------------
# generic tiled matmul, bf16 operands, f32 accumulation in the resident output
# block, fused bias (+ optional ReLU) epilogue.
# ----------------------------------------------------------------------------
def _matmul_kernel(a_ref, b_ref, bias_ref, o_ref, *, relu):
    kidx = pl.program_id(2)
    part = jnp.dot(a_ref[...], b_ref[...], preferred_element_type=jnp.float32)

    @pl.when(kidx == 0)
    def _():
        o_ref[...] = jnp.zeros_like(o_ref)

    acc = o_ref[...] + part
    o_ref[...] = acc

    @pl.when(kidx == pl.num_programs(2) - 1)
    def _():
        r = acc + bias_ref[...]
        if relu:
            r = jnp.maximum(r, 0.0)
        o_ref[...] = r


def matmul_bias_act(a, b, bias, *, relu=False, tm=256, tk=256, tn=256):
    """(M,K) @ (K,N) + bias[N], optional ReLU.  bf16 MXU operands, f32 out."""
    M, K = a.shape
    K2, N = b.shape
    assert K == K2
    a = a.astype(jnp.bfloat16)
    b = b.astype(jnp.bfloat16)
    bias = bias.astype(jnp.float32).reshape(1, N)

    tm = min(tm, _round_up(M, 8))
    tk = min(tk, _round_up(K, 128))
    tn = min(tn, _round_up(N, 128))
    Mp, Kp, Np = _round_up(M, tm), _round_up(K, tk), _round_up(N, tn)

    a_p = a if (Mp == M and Kp == K) else jnp.pad(a, ((0, Mp - M), (0, Kp - K)))
    b_p = b if (Kp == K and Np == N) else jnp.pad(b, ((0, Kp - K), (0, Np - N)))
    bias_p = bias if Np == N else jnp.pad(bias, ((0, 0), (0, Np - N)))

    out = pl.pallas_call(
        functools.partial(_matmul_kernel, relu=relu),
        out_shape=jax.ShapeDtypeStruct((Mp, Np), jnp.float32),
        grid_spec=pltpu.PrefetchScalarGridSpec(
            num_scalar_prefetch=0,
            grid=(Mp // tm, Np // tn, Kp // tk),
            in_specs=[
                pl.BlockSpec((tm, tk), lambda i, j, k: (i, k)),
                pl.BlockSpec((tk, tn), lambda i, j, k: (k, j)),
                pl.BlockSpec((1, tn), lambda i, j, k: (0, j)),
            ],
            out_specs=pl.BlockSpec((tm, tn), lambda i, j, k: (i, j)),
        ),
        compiler_params=pltpu.CompilerParams(
            dimension_semantics=("parallel", "parallel", "arbitrary")),
    )(a_p, b_p, bias_p)
    if Mp == M and Np == N:
        return out
    return out[:M, :N]


# ----------------------------------------------------------------------------
# direct conv2d (stride 1): no im2col.  Grid = (B, Ho, k); the output row block
# stays resident across the dy axis; the k dx taps are accumulated in-kernel
# from a single padded input row; full bf16 weights stay resident in VMEM.
# ----------------------------------------------------------------------------
def _conv_row_kernel(x_ref, w_ref, b_ref, o_ref, *, k, wo, relu):
    dy = pl.program_id(2)

    @pl.when(dy == 0)
    def _():
        o_ref[...] = jnp.zeros_like(o_ref)

    x = x_ref[...]                                  # (Wp, Cin)  bf16
    acc = o_ref[...]                                # (Wo, Cout) f32
    for dx in range(k):
        acc = acc + jnp.dot(x[dx:dx + wo, :], w_ref[dy * k + dx],
                            preferred_element_type=jnp.float32)
    o_ref[...] = acc

    @pl.when(dy == k - 1)
    def _():
        r = acc + b_ref[...]
        if relu:
            r = jnp.maximum(r, 0.0)
        o_ref[...] = r


def conv2d_direct(x, w, b, *, pad, relu):
    """x: NHWC (any float dtype), w: [Cout, Cin, k, k] (PyTorch), b: [Cout]."""
    B, H, W, _ = x.shape
    cout, cin, k, _ = w.shape
    xp = x.astype(jnp.bfloat16)
    if pad:
        xp = jnp.pad(xp, ((0, 0), (pad, pad), (pad, pad), (0, 0)))
    Hp, Wp = H + 2 * pad, W + 2 * pad
    Ho, Wo = Hp - k + 1, Wp - k + 1
    wt = jnp.transpose(w, (2, 3, 1, 0)).reshape(k * k, cin, cout).astype(jnp.bfloat16)
    bias = b.reshape(1, cout).astype(jnp.float32)

    return pl.pallas_call(
        functools.partial(_conv_row_kernel, k=k, wo=Wo, relu=relu),
        out_shape=jax.ShapeDtypeStruct((B, Ho, Wo, cout), jnp.float32),
        grid_spec=pltpu.PrefetchScalarGridSpec(
            num_scalar_prefetch=0,
            grid=(B, Ho, k),
            in_specs=[
                pl.BlockSpec((None, None, Wp, cin), lambda bi, y, dy: (bi, y + dy, 0, 0)),
                pl.BlockSpec((k * k, cin, cout), lambda bi, y, dy: (0, 0, 0)),
                pl.BlockSpec((1, cout), lambda bi, y, dy: (0, 0)),
            ],
            out_specs=pl.BlockSpec((None, None, Wo, cout), lambda bi, y, dy: (bi, y, 0, 0)),
        ),
        compiler_params=pltpu.CompilerParams(
            dimension_semantics=("parallel", "parallel", "arbitrary"),
            vmem_limit_bytes=48 * 1024 * 1024),
    )(xp, wt, bias)


# ----------------------------------------------------------------------------
# max pooling, tiled over (B, output-row) with the 2x2 window max done in-kernel
# ----------------------------------------------------------------------------
def _pool_s2_kernel(x_ref, o_ref):
    x = x_ref[...]                     # (2, Wo, 2, C)
    r = jnp.maximum(x[0], x[1])        # (Wo, 2, C)
    o_ref[...] = jnp.max(r, axis=1)    # (Wo, C)


def maxpool_2x2_s2(x):
    """MaxPool2d(kernel=2, stride=2, padding=0) on NHWC."""
    B, H, W, C = x.shape
    Ho, Wo = H // 2, W // 2
    x = x[:, :2 * Ho, :2 * Wo, :]
    x5 = x.reshape(B, 2 * Ho, Wo, 2, C)     # pure reshape: W pairs fold next to C
    return pl.pallas_call(
        _pool_s2_kernel,
        out_shape=jax.ShapeDtypeStruct((B, Ho, Wo, C), x.dtype),
        grid_spec=pltpu.PrefetchScalarGridSpec(
            num_scalar_prefetch=0,
            grid=(B, Ho),
            in_specs=[pl.BlockSpec((None, 2, Wo, 2, C), lambda b, y: (b, y, 0, 0, 0))],
            out_specs=pl.BlockSpec((None, None, Wo, C), lambda b, y: (b, y, 0, 0)),
        ),
        compiler_params=pltpu.CompilerParams(
            dimension_semantics=("parallel", "parallel")),
    )(x5)


def _pool_s21_kernel(x_ref, o_ref, *, wo):
    x = x_ref[...]                     # (2, Wp, C)
    r = jnp.maximum(x[0], x[1])        # (Wp, C)
    o_ref[...] = jnp.maximum(r[:wo, :], r[1:wo + 1, :])


def maxpool_s21(x):
    """MaxPool2d(kernel=(2,2), stride=(2,1), padding=(0,1)) on NHWC."""
    B, H, W, C = x.shape
    Ho = (H - 2) // 2 + 1
    Wo = W + 1
    neg = jnp.full((B, H, 1, C), -jnp.inf, x.dtype)
    xp = jnp.concatenate([neg, x, neg], axis=2)[:, :2 * Ho, :, :]
    return pl.pallas_call(
        functools.partial(_pool_s21_kernel, wo=Wo),
        out_shape=jax.ShapeDtypeStruct((B, Ho, Wo, C), x.dtype),
        grid_spec=pltpu.PrefetchScalarGridSpec(
            num_scalar_prefetch=0,
            grid=(B, Ho),
            in_specs=[pl.BlockSpec((None, 2, W + 2, C), lambda b, y: (b, y, 0, 0))],
            out_specs=pl.BlockSpec((None, None, Wo, C), lambda b, y: (b, y, 0, 0)),
        ),
        compiler_params=pltpu.CompilerParams(
            dimension_semantics=("parallel", "parallel")),
    )(xp)


# ----------------------------------------------------------------------------
# BatchNorm2d (training-mode global batch stats) + ReLU:
#   pass 1 : grid-accumulated per-channel sum / sum-of-squares (exact stats)
#   pass 2 : tiled normalize + ReLU
# ----------------------------------------------------------------------------
def _bn_stats_kernel(x_ref, sum_ref, sq_ref):
    @pl.when(pl.program_id(0) == 0)
    def _():
        sum_ref[...] = jnp.zeros_like(sum_ref)
        sq_ref[...] = jnp.zeros_like(sq_ref)

    x = x_ref[...]
    sum_ref[...] += jnp.sum(x, axis=0, keepdims=True)
    sq_ref[...] += jnp.sum(x * x, axis=0, keepdims=True)


def _bn_apply_kernel(x_ref, scale_ref, shift_ref, o_ref):
    o_ref[...] = jnp.maximum(x_ref[...] * scale_ref[...] + shift_ref[...], 0.0)


def batchnorm_relu(x, gamma, beta, *, eps=1e-5, row_tile=512):
    B, H, W, C = x.shape
    n = B * H * W
    x2 = x.reshape(n, C).astype(jnp.float32)
    rt = min(row_tile, _round_up(n, 8))
    n_p = _round_up(n, rt)
    x2p = x2 if n_p == n else jnp.pad(x2, ((0, n_p - n), (0, 0)))  # zero rows: stats use true n
    grid = (n_p // rt,)

    s, sq = pl.pallas_call(
        _bn_stats_kernel,
        out_shape=(jax.ShapeDtypeStruct((1, C), jnp.float32),
                   jax.ShapeDtypeStruct((1, C), jnp.float32)),
        grid_spec=pltpu.PrefetchScalarGridSpec(
            num_scalar_prefetch=0,
            grid=grid,
            in_specs=[pl.BlockSpec((rt, C), lambda i: (i, 0))],
            out_specs=[pl.BlockSpec((1, C), lambda i: (0, 0)),
                       pl.BlockSpec((1, C), lambda i: (0, 0))],
        ),
        compiler_params=pltpu.CompilerParams(dimension_semantics=("arbitrary",)),
    )(x2p)

    mean = s / n
    var = sq / n - mean * mean
    scale = gamma.reshape(1, C) * jax.lax.rsqrt(var + eps)
    shift = beta.reshape(1, C) - mean * scale

    outp = pl.pallas_call(
        _bn_apply_kernel,
        out_shape=jax.ShapeDtypeStruct((n_p, C), jnp.float32),
        grid_spec=pltpu.PrefetchScalarGridSpec(
            num_scalar_prefetch=0,
            grid=grid,
            in_specs=[pl.BlockSpec((rt, C), lambda i: (i, 0)),
                      pl.BlockSpec((1, C), lambda i: (0, 0)),
                      pl.BlockSpec((1, C), lambda i: (0, 0))],
            out_specs=pl.BlockSpec((rt, C), lambda i: (i, 0)),
        ),
        compiler_params=pltpu.CompilerParams(dimension_semantics=("parallel",)),
    )(x2p, scale.astype(jnp.float32), shift.astype(jnp.float32))
    return outp[:n].reshape(B, H, W, C)


# ----------------------------------------------------------------------------
# attention + LSTM decoder recurrence: one grid step == one decode step.
# Hidden dim is zero-padded to 128 (lane-dense state, aligned gate slices).
# The embedding part of the LSTM input projection (+ biases) is hoisted out of
# the serial loop and streamed per step.
# ----------------------------------------------------------------------------
def _decoder_step_kernel(src_ref, sf_ref, embp_ref, wh2h_ref, bh2h_ref,
                         wsc_ref, wihc_ref, whh_ref, out_ref, h_sc, c_sc):
    t = pl.program_id(0)
    hdp = h_sc.shape[-1]

    @pl.when(t == 0)
    def _():
        h_sc[...] = jnp.zeros_like(h_sc)
        c_sc[...] = jnp.zeros_like(c_sc)

    h_prev = h_sc[...]                                    # (B, Hdp) f32
    c_prev = c_sc[...]
    h_bf = h_prev.astype(jnp.bfloat16)

    # attention: score(tanh(i2h(src) + h2h(h_prev))) -> softmax -> context
    proj = jnp.dot(h_bf, wh2h_ref[...], preferred_element_type=jnp.float32)
    proj = proj + bh2h_ref[...]                           # (B, Hdp)
    act = jnp.tanh(sf_ref[...].astype(jnp.float32) + proj[:, None, :])  # (B,L,Hdp)
    logit = jnp.sum(act * wsc_ref[...], axis=-1)          # (B, L)
    m = jnp.max(logit, axis=-1, keepdims=True)
    e = jnp.exp(logit - m)
    alpha = e / jnp.sum(e, axis=-1, keepdims=True)        # (B, L)
    context = jnp.sum(alpha[:, :, None] * src_ref[...].astype(jnp.float32), axis=1)

    # LSTMCell on concat([context, embedding]); embedding projection + biases
    # are pre-computed (embp_ref).  Gates laid out as 4 x Hdp (128-aligned).
    gates = (jnp.dot(context.astype(jnp.bfloat16), wihc_ref[...],
                     preferred_element_type=jnp.float32)
             + jnp.dot(h_bf, whh_ref[...], preferred_element_type=jnp.float32)
             + embp_ref[0])                               # (B, 4*Hdp)
    i_g = _sigmoid(gates[:, 0 * hdp:1 * hdp])
    f_g = _sigmoid(gates[:, 1 * hdp:2 * hdp])
    g_g = jnp.tanh(gates[:, 2 * hdp:3 * hdp])
    o_g = _sigmoid(gates[:, 3 * hdp:4 * hdp])
    c_new = f_g * c_prev + i_g * g_g
    h_new = o_g * jnp.tanh(c_new)

    h_sc[...] = h_new
    c_sc[...] = c_new
    out_ref[0] = h_new


def attention_decoder(p, src, text):
    B, L, C = src.shape
    T = text.shape[1] - 1                     # num_steps = batch_max_length - 1
    Hdp = p["h2h_t"].shape[0]                 # padded hidden dim (multiple of 128)

    # i2h(src): time-invariant -> computed once with the tiled matmul
    sf = matmul_bias_act(src.reshape(B * L, C), p["i2h_t"],
                         jnp.zeros((Hdp,), jnp.float32), relu=False)
    sf = sf.reshape(B, L, Hdp).astype(jnp.bfloat16)

    # hoisted embedding projection: emb @ W_ih_e + (b_ih + b_hh)
    emb_all = jnp.take(p["emb"], text[:, :T], axis=0)     # (B, T, E)
    emb_seq = jnp.transpose(emb_all, (1, 0, 2)).reshape(T * B, -1)
    emb_proj = matmul_bias_act(emb_seq, p["w_ih_e"], p["b_lstm"], relu=False)
    emb_proj = emb_proj.reshape(T, B, 4 * Hdp)

    src_bf = src.astype(jnp.bfloat16)

    grid_spec = pltpu.PrefetchScalarGridSpec(
        num_scalar_prefetch=0,
        grid=(T,),
        in_specs=[
            pl.BlockSpec((B, L, C), lambda t: (0, 0, 0)),
            pl.BlockSpec((B, L, Hdp), lambda t: (0, 0, 0)),
            pl.BlockSpec((1, B, 4 * Hdp), lambda t: (t, 0, 0)),
            pl.BlockSpec((Hdp, Hdp), lambda t: (0, 0)),
            pl.BlockSpec((1, Hdp), lambda t: (0, 0)),
            pl.BlockSpec((1, Hdp), lambda t: (0, 0)),
            pl.BlockSpec((C, 4 * Hdp), lambda t: (0, 0)),
            pl.BlockSpec((Hdp, 4 * Hdp), lambda t: (0, 0)),
        ],
        out_specs=pl.BlockSpec((1, B, Hdp), lambda t: (t, 0, 0)),
        scratch_shapes=[pltpu.VMEM((B, Hdp), jnp.float32),
                        pltpu.VMEM((B, Hdp), jnp.float32)],
    )
    out_h = pl.pallas_call(
        _decoder_step_kernel,
        out_shape=jax.ShapeDtypeStruct((T, B, Hdp), jnp.float32),
        grid_spec=grid_spec,
        compiler_params=pltpu.CompilerParams(dimension_semantics=("arbitrary",)),
    )(src_bf, sf, emb_proj,
      p["h2h_t"].astype(jnp.bfloat16), p["h2h_b"].reshape(1, Hdp),
      p["score_w"].reshape(1, Hdp),
      p["w_ih_c"].astype(jnp.bfloat16), p["w_hh_t"].astype(jnp.bfloat16))

    # generator(output_hiddens)
    hid = jnp.transpose(out_h, (1, 0, 2)).reshape(B * T, Hdp)
    num_classes = p["gen_w_t"].shape[1]
    probs = matmul_bias_act(hid, p["gen_w_t"], p["gen_b"], relu=False)
    return probs.reshape(B, T, num_classes)


# ----------------------------------------------------------------------------
# CNN encoder (Semi-ASTER backbone)
# ----------------------------------------------------------------------------
def cnn_encoder(p, x_nchw):
    x = jnp.transpose(x_nchw, (0, 2, 3, 1)).astype(jnp.float32)   # NCHW -> NHWC
    x = conv2d_direct(x, p["conv0_w"], p["conv0_b"], pad=1, relu=True)
    x = maxpool_2x2_s2(x)
    x = conv2d_direct(x, p["conv1_w"], p["conv1_b"], pad=1, relu=True)
    x = maxpool_2x2_s2(x)
    x = conv2d_direct(x, p["conv2_w"], p["conv2_b"], pad=1, relu=False)
    x = batchnorm_relu(x, p["bn2_gamma"], p["bn2_beta"])
    x = conv2d_direct(x, p["conv3_w"], p["conv3_b"], pad=1, relu=True)
    x = maxpool_s21(x)
    x = conv2d_direct(x, p["conv4_w"], p["conv4_b"], pad=1, relu=False)
    x = batchnorm_relu(x, p["bn4_gamma"], p["bn4_beta"])
    x = conv2d_direct(x, p["conv5_w"], p["conv5_b"], pad=1, relu=True)
    x = maxpool_s21(x)
    x = conv2d_direct(x, p["conv6_w"], p["conv6_b"], pad=0, relu=False)
    x = batchnorm_relu(x, p["bn6_gamma"], p["bn6_beta"])
    return x                                                      # [B,Ho,Wo,512]


def attention_forward(params, x_nchw, text, is_train=True,
                      teacher_forcing_ratio=1.0):
    feat = cnn_encoder(params, x_nchw)
    B, Ho, Wo, C = feat.shape
    # == out.view(b, c, h*w).transpose(1, 2) in NCHW land
    src = feat.reshape(B, Ho * Wo, C)
    # teacher-forcing branch (is_train=True, teacher_forcing_ratio=1.0 => always taken)
    # TODO(synk): greedy autoregressive (non-teacher-forcing) decode path and
    #             beam_search are inference-time control flow, not implemented.
    return attention_decoder(params, src, text)


# ----------------------------------------------------------------------------
# deterministic parameter init (shapes follow the PyTorch module __init__);
# decoder hidden dim is zero-padded to a multiple of 128 for lane density.
# ----------------------------------------------------------------------------
def init_params(key, nc, num_classes, embedding_dim, hidden_dim, src_dim=512):
    keys = iter(jax.random.split(key, 40))

    def nrm(shape, fan_in):
        return jax.random.normal(next(keys), shape, jnp.float32) * (1.0 / math.sqrt(fan_in))

    p = {}
    chans = [64, 128, 256, 256, 512, 512, 512]
    kss = [3, 3, 3, 3, 3, 3, 2]
    cin = nc
    for i, (co, kk) in enumerate(zip(chans, kss)):
        p[f"conv{i}_w"] = nrm((co, cin, kk, kk), cin * kk * kk)
        p[f"conv{i}_b"] = jnp.zeros((co,), jnp.float32)
        cin = co
    for i in (2, 4, 6):
        p[f"bn{i}_gamma"] = jnp.ones((chans[i],), jnp.float32)
        p[f"bn{i}_beta"] = jnp.zeros((chans[i],), jnp.float32)

    E, Hd, C = embedding_dim, hidden_dim, src_dim
    Hdp = _round_up(Hd, 128)

    p["emb"] = jax.random.normal(next(keys), (num_classes + 1, E), jnp.float32)
    p["i2h_t"] = _pad_axis(nrm((C, Hd), C), 1, Hdp)                       # i2h (no bias)
    p["h2h_t"] = _pad_axis(_pad_axis(nrm((Hd, Hd), Hd), 1, Hdp), 0, Hdp)  # h2h weight^T
    p["h2h_b"] = jnp.zeros((Hdp,), jnp.float32)
    p["score_w"] = _pad_axis(nrm((Hd,), Hd), 0, Hdp)                      # score (no bias)
    p["w_ih_c"] = _pad_axis(nrm((C, 4, Hd), Hd), 2, Hdp).reshape(C, 4 * Hdp)
    p["w_ih_e"] = _pad_axis(nrm((E, 4, Hd), Hd), 2, Hdp).reshape(E, 4 * Hdp)
    p["w_hh_t"] = _pad_axis(_pad_axis(nrm((Hd, 4, Hd), Hd), 2, Hdp),
                            0, Hdp).reshape(Hdp, 4 * Hdp)
    p["b_lstm"] = jnp.zeros((4 * Hdp,), jnp.float32)                      # b_ih + b_hh
    p["gen_w_t"] = _pad_axis(nrm((Hd, num_classes), Hd), 0, Hdp)
    p["gen_b"] = jnp.zeros((num_classes,), jnp.float32)
    return p


if __name__ == "__main__":
    B, nc, Hin, Win = 2, 1, 32, 32          # small NCHW input image, like PyTorch
    num_classes, embedding_dim, hidden_dim = 10, 32, 32
    T_text = 6                              # expected.size(1) => 5 decode steps

    params = init_params(jax.random.PRNGKey(0), nc, num_classes,
                         embedding_dim, hidden_dim, src_dim=512)
    kx, kt = jax.random.split(jax.random.PRNGKey(0))
    x = jax.random.normal(kx, (B, nc, Hin, Win), jnp.float32)
    expected = jax.random.randint(kt, (B, T_text), 0, num_classes + 1)

    probs = attention_forward(params, x, expected,
                              is_train=True, teacher_forcing_ratio=1.0)
    probs = jax.block_until_ready(probs)

    assert probs.shape == (B, T_text - 1, num_classes), probs.shape
    assert bool(jnp.all(jnp.isfinite(probs)))
    print("KERNEL_OK")
</pallas_src>

<mosaic_0001>
module attributes {stable_mosaic.version = 11 : i64} {
  func.func @_conv_row_kernel(%arg0: i32, %arg1: i32, %arg2: i32, %arg3: memref<1x1x34x1xbf16, #tpu.memory_space<vmem>>, %arg4: memref<9x1x64xbf16, #tpu.memory_space<vmem>>, %arg5: memref<1x64xf32, #tpu.memory_space<vmem>>, %arg6: memref<1x1x32x64xf32, #tpu.memory_space<vmem>>) attributes {dimension_semantics = [#tpu.dimension_semantics<parallel>, #tpu.dimension_semantics<parallel>, #tpu.dimension_semantics<arbitrary>], iteration_bounds = array<i64: 2, 32, 3>, scalar_prefetch = 0 : i64, scratch_operands = 0 : i64, tpu.core_type = #tpu.core_type<tc>, window_params = [{transform_indices = @transform_0, window_bounds = array<i64: 1, 1, 34, 1>}, {pipeline_mode = #tpu.pipeline_mode<synchronous>, transform_indices = @transform_1, window_bounds = array<i64: 9, 1, 64>}, {pipeline_mode = #tpu.pipeline_mode<synchronous>, transform_indices = @transform_2, window_bounds = array<i64: 1, 64>}, {transform_indices = @transform_3, window_bounds = array<i64: 1, 1, 32, 64>}]} {
    %c0_i32 = arith.constant 0 : i32
    %0 = arith.cmpi eq, %arg2, %c0_i32 : i32
    %1 = arith.extui %0 : i1 to i32
    %c0_i32_0 = arith.constant 0 : i32
    %2 = arith.cmpi ne, %1, %c0_i32_0 : i32
    scf.if %2 {
      %cst_25 = arith.constant 0.000000e+00 : f32
      %37 = vector.broadcast %cst_25 : f32 to vector<32x64xf32>
      %c0_26 = arith.constant 0 : index
      %c0_27 = arith.constant 0 : index
      %c0_28 = arith.constant 0 : index
      %c0_29 = arith.constant 0 : index
      %38 = vector.load %arg6[%c0_26, %c0_27, %c0_28, %c0_29] : memref<1x1x32x64xf32, #tpu.memory_space<vmem>>, vector<1x1x32x64xf32>
      %39 = vector.shape_cast %38 : vector<1x1x32x64xf32> to vector<32x64xf32>
      %40 = vector.shape_cast %37 : vector<32x64xf32> to vector<1x1x32x64xf32>
      tpu.vector_store %arg6[%c0_26, %c0_27, %c0_28, %c0_29], %40 {strides = array<i32>} : memref<1x1x32x64xf32, #tpu.memory_space<vmem>>, vector<1x1x32x64xf32>,
    } else {
    }
    %c0 = arith.constant 0 : index
    %c0_1 = arith.constant 0 : index
    %c0_2 = arith.constant 0 : index
    %c0_3 = arith.constant 0 : index
    %3 = vector.load %arg3[%c0, %c0_1, %c0_2, %c0_3] : memref<1x1x34x1xbf16, #tpu.memory_space<vmem>>, vector<1x1x34x1xbf16>
    %4 = vector.shape_cast %3 : vector<1x1x34x1xbf16> to vector<34x1xbf16>
    %c0_4 = arith.constant 0 : index
    %c0_5 = arith.constant 0 : index
    %c0_6 = arith.constant 0 : index
    %c0_7 = arith.constant 0 : index
    %5 = vector.load %arg6[%c0_4, %c0_5, %c0_6, %c0_7] : memref<1x1x32x64xf32, #tpu.memory_space<vmem>>, vector<1x1x32x64xf32>
    %6 = vector.shape_cast %5 : vector<1x1x32x64xf32> to vector<32x64xf32>
    %7 = vector.extract_strided_slice %4 {offsets = [0, 0], sizes = [32, 1], strides = [1, 1]} : vector<34x1xbf16> to vector<32x1xbf16>
    %c3_i32 = arith.constant 3 : i32
    %8 = arith.muli %arg2, %c3_i32 : i32
    %c0_i32_8 = arith.constant 0 : i32
    %9 = arith.addi %8, %c0_i32_8 : i32
    %10 = arith.index_cast %9 : i32 to index
    %c0_9 = arith.constant 0 : index
    %c0_10 = arith.constant 0 : index
    %11 = vector.load %arg4[%10, %c0_9, %c0_10] : memref<9x1x64xbf16, #tpu.memory_space<vmem>>, vector<1x1x64xbf16>
    %12 = vector.shape_cast %11 : vector<1x1x64xbf16> to vector<1x64xbf16>
    %cst = arith.constant dense<0.000000e+00> : vector<32x64xf32>
    %13 = tpu.matmul %7, %12, %cst {dimension_numbers = #tpu.dot_dimension_numbers<[1], [0], [0], [1], [0, 0, 1, 1], [], []>} : vector<32x1xbf16>, vector<1x64xbf16>, vector<32x64xf32> -> vector<32x64xf32>
    %14 = arith.addf %6, %13 : vector<32x64xf32>
    %15 = vector.extract_strided_slice %4 {offsets = [1, 0], sizes = [32, 1], strides = [1, 1]} : vector<34x1xbf16> to vector<32x1xbf16>
    %c3_i32_11 = arith.constant 3 : i32
    %16 = arith.muli %arg2, %c3_i32_11 : i32
    %c1_i32 = arith.constant 1 : i32
    %17 = arith.addi %16, %c1_i32 : i32
    %18 = arith.index_cast %17 : i32 to index
    %c0_12 = arith.constant 0 : index
    %c0_13 = arith.constant 0 : index
    %19 = vector.load %arg4[%18, %c0_12, %c0_13] : memref<9x1x64xbf16, #tpu.memory_space<vmem>>, vector<1x1x64xbf16>
    %20 = vector.shape_cast %19 : vector<1x1x64xbf16> to vector<1x64xbf16>
    %cst_14 = arith.constant dense<0.000000e+00> : vector<32x64xf32>
    %21 = tpu.matmul %15, %20, %cst_14 {dimension_numbers = #tpu.dot_dimension_numbers<[1], [0], [0], [1], [0, 0, 1, 1], [], []>} : vector<32x1xbf16>, vector<1x64xbf16>, vector<32x64xf32> -> vector<32x64xf32>
    %22 = arith.addf %14, %21 : vector<32x64xf32>
    %23 = vector.extract_strided_slice %4 {offsets = [2, 0], sizes = [32, 1], strides = [1, 1]} : vector<34x1xbf16> to vector<32x1xbf16>
    %c3_i32_15 = arith.constant 3 : i32
    %24 = arith.muli %arg2, %c3_i32_15 : i32
    %c2_i32 = arith.constant 2 : i32
    %25 = arith.addi %24, %c2_i32 : i32
    %26 = arith.index_cast %25 : i32 to index
    %c0_16 = arith.constant 0 : index
    %c0_17 = arith.constant 0 : index
    %27 = vector.load %arg4[%26, %c0_16, %c0_17] : memref<9x1x64xbf16, #tpu.memory_space<vmem>>, vector<1x1x64xbf16>
    %28 = vector.shape_cast %27 : vector<1x1x64xbf16> to vector<1x64xbf16>
    %cst_18 = arith.constant dense<0.000000e+00> : vector<32x64xf32>
    %29 = tpu.matmul %23, %28, %cst_18 {dimension_numbers = #tpu.dot_dimension_numbers<[1], [0], [0], [1], [0, 0, 1, 1], [], []>} : vector<32x1xbf16>, vector<1x64xbf16>, vector<32x64xf32> -> vector<32x64xf32>
    %30 = arith.addf %22, %29 : vector<32x64xf32>
    %c0_19 = arith.constant 0 : index
    %c0_20 = arith.constant 0 : index
    %c0_21 = arith.constant 0 : index
    %c0_22 = arith.constant 0 : index
    %31 = vector.load %arg6[%c0_19, %c0_20, %c0_21, %c0_22] : memref<1x1x32x64xf32, #tpu.memory_space<vmem>>, vector<1x1x32x64xf32>
    %32 = vector.shape_cast %31 : vector<1x1x32x64xf32> to vector<32x64xf32>
    %33 = vector.shape_cast %30 : vector<32x64xf32> to vector<1x1x32x64xf32>
    tpu.vector_store %arg6[%c0_19, %c0_20, %c0_21, %c0_22], %33 {strides = array<i32>} : memref<1x1x32x64xf32, #tpu.memory_space<vmem>>, vector<1x1x32x64xf32>,
    %c2_i32_23 = arith.constant 2 : i32
    %34 = arith.cmpi eq, %arg2, %c2_i32_23 : i32
    %35 = arith.extui %34 : i1 to i32
    %c0_i32_24 = arith.constant 0 : i32
    %36 = arith.cmpi ne, %35, %c0_i32_24 : i32
    scf.if %36 {
      %c0_25 = arith.constant 0 : index
      %c0_26 = arith.constant 0 : index
      %37 = vector.load %arg5[%c0_25, %c0_26] : memref<1x64xf32, #tpu.memory_space<vmem>>, vector<1x64xf32>
      %38 = vector.broadcast %37 : vector<1x64xf32> to vector<32x64xf32>
      %39 = arith.addf %30, %38 : vector<32x64xf32>
      %cst_27 = arith.constant 0.000000e+00 : f32
      %40 = vector.broadcast %cst_27 : f32 to vector<32x64xf32>
      %41 = arith.maximumf %39, %40 : vector<32x64xf32>
      %c0_28 = arith.constant 0 : index
      %c0_29 = arith.constant 0 : index
      %c0_30 = arith.constant 0 : index
      %c0_31 = arith.constant 0 : index
      %42 = vector.load %arg6[%c0_28, %c0_29, %c0_30, %c0_31] : memref<1x1x32x64xf32, #tpu.memory_space<vmem>>, vector<1x1x32x64xf32>
      %43 = vector.shape_cast %42 : vector<1x1x32x64xf32> to vector<32x64xf32>
      %44 = vector.shape_cast %41 : vector<32x64xf32> to vector<1x1x32x64xf32>
      tpu.vector_store %arg6[%c0_28, %c0_29, %c0_30, %c0_31], %44 {strides = array<i32>} : memref<1x1x32x64xf32, #tpu.memory_space<vmem>>, vector<1x1x32x64xf32>,
    } else {
    }
    return
  }
  func.func @transform_0(%arg0: i32, %arg1: i32, %arg2: i32) -> (i32, i32, i32, i32) {
    %0 = arith.addi %arg1, %arg2 : i32
    %c0_i32 = arith.constant 0 : i32
    %c0_i32_0 = arith.constant 0 : i32
    %c0_i32_1 = arith.constant 0 : i32
    return %arg0, %0, %c0_i32, %c0_i32_0 : i32, i32, i32, i32
  }
  func.func @transform_1(%arg0: i32, %arg1: i32, %arg2: i32) -> (i32, i32, i32) {
    %c0_i32 = arith.constant 0 : i32
    %c0_i32_0 = arith.constant 0 : i32
    %c0_i32_1 = arith.constant 0 : i32
    %c0_i32_2 = arith.constant 0 : i32
    return %c0_i32, %c0_i32_0, %c0_i32_1 : i32, i32, i32
  }
  func.func @transform_2(%arg0: i32, %arg1: i32, %arg2: i32) -> (i32, i32) {
    %c0_i32 = arith.constant 0 : i32
    %c0_i32_0 = arith.constant 0 : i32
    %c0_i32_1 = arith.constant 0 : i32
    return %c0_i32, %c0_i32_0 : i32, i32
  }
  func.func @transform_3(%arg0: i32, %arg1: i32, %arg2: i32) -> (i32, i32, i32, i32) {
    %c0_i32 = arith.constant 0 : i32
    %c0_i32_0 = arith.constant 0 : i32
    %c0_i32_1 = arith.constant 0 : i32
    return %arg0, %arg1, %c0_i32, %c0_i32_0 : i32, i32, i32, i32
  }
}

</mosaic_0001>

<bundles_post_ra>
// kernel: tpu_custom_call.1
= control target key start
LH: loop header
LB: loop body
LE: loop exit
PB: predicated region body
PF: predicated region fallthrough
CT: control target
= control target key end

     0   :  { %s975_s0 = inlined_call_operand.vmem [shape: bf16[2,34,34,1], index: 0, kind: input, shape index: {}]   ;;  %s976_s1 = inlined_call_operand.vmem [shape: bf16[9,1,64], index: 1, kind: input, shape index: {}]   ;;  %s977_s2 = inlined_call_operand.vmem [shape: f32[1,64], index: 2, kind: input, shape index: {}]   ;;  %s978_s3 = inlined_call_operand.hbm [shape: f32[2,32,32,64], index: 3, kind: output, shape index: {}]  }
   0x1   :  { %980 = sst [smem:[#allocation6_spill]] %s975_s0 }
   0x2   :  { %8 = vsyncpa [#allocation3], 0 }
   0x3   :  { %10 = vsyncpa [#allocation3 + $0x1], 0  ;;  %s783_s12 = smov 0   ;;  %s785_s13 = smov 0  }
   0x4   :  { %s787_s14 = smov 0   ;;  %s789_s15 = smov 0  }
   0x5   :  { %s791_s16 = smov 0   ;;  %s793_s17 = smov 0  }
   0x6   :  { %s795_s18 = smov 0   ;;  %s797_s19 = smov 0  }
   0x7   :  { %s799_s20 = smov 0   ;;  %s801_s21 = smov 0  }
   0x8 LB: > { %s519_s22 = sadd.s32 4294967295, %s757_s21   ;;  %s520_s23 = sadd.s32 4294967294, %s757_s21   ;;  %s757_s21 = sphi %s801_s21, %s16_s21   ;;  %s753_s20 = sphi %s799_s20, %s994_s20   ;;  %s749_s19 = sphi %s797_s19, %s993_s19   ;;  %s745_s18 = sphi %s795_s18, %s992_s18   ;;  %s741_s17 = sphi %s793_s17, %s991_s17   ;;  %s737_s16 = sphi %s791_s16, %s990_s16   ;;  %s733_s15 = sphi %s789_s15, %s989_s15   ;;  %s729_s14 = sphi %s787_s14, %s988_s14   ;;  %s725_s13 = sphi %s785_s13, %s987_s13   ;;  %s721_s12 = sphi %s783_s12, %s986_s12  }
   0x9   : > { %s28_s24 = sadd.s32 1, %s745_s18  ;;  %s31_s25 = sadd.s32 1, %s749_s19 }
   0xa   : > { %p29_p0 = scmp.ge.s32.totalorder %s28_s24, 3  ;;  %s35_s26 = sadd.s32 1, %s753_s20 }
   0xb   : > { %p126_p1 = scmp.ne.s32.totalorder %s729_s14, %s725_s13  ;;  %p127_p2 = scmp.eq.s32.totalorder %s519_s22, 191 }
   0xc   : > { %s996_s24 = smov (%p29_p0, %s28_s24), 0  ;;  %s998_s25 = smov (!%p29_p0, %s31_s25), %s749_s19 }
   0xd   : > { %p132_p3 = scmp.ne.s32.totalorder %s725_s13, %s721_s12  ;;  %p33_p4 = scmp.ge.s32.totalorder %s998_s25, 32 }
   0xe   : > { %p133_p5 = scmp.eq.s32.totalorder %s520_s23, 191  ;;  %p845_p6 = por %p127_p2, %p126_p1 }
   0xf   : > { %s1000_s25 = smov (%p33_p4, %s998_s25), 0  ;;  %s1002_s26 = smov (!%p33_p4, %s35_s26), %s753_s20 }
  0x10   : > { %p852_p7 = por %p133_p5, %p132_p3  ;;  %p523_p8 = scmp.ge.s32.totalorder %s757_s21, 1 }
  0x11   : > { %p37_p9 = scmp.ge.s32.totalorder %s1002_s26, 2  ;;  %p171_p10 = scmp.lt.s32.totalorder %s757_s21, 193 }
  0x12   : > { %s112_s29 = ssub.s32 %s749_s19, %s1000_s25  ;;  %s116_s5 = sadd.s32 1, %s729_s14 }
  0x13   : > { %s1004_s26 = smov (%p37_p9, %s1002_s26), 0  ;;  %p172_p11 = pnand %p523_p8, %p171_p10 }
  0x14   : > { %983 = sst [smem:[#allocation5_spill]] %s1004_s26  ;;  %s111_s30 = ssub.s32 %s753_s20, %s1004_s26 }
  0x15   : > { %s113_s4 = sor.u32 %s112_s29, %s111_s30  ;;  %175 = sbr.rel (%p172_p11) target bundleno = 236 (0xec), region = 32 }
  0x16   : > { %p114_p12 = scmp.eq.s32.totalorder %s113_s4, 0  ;;  %s197_s7 = sand.u32 (!%p172_p11), 1, %s725_s13  }
  0x17   : > { %s200_s8 = sadd.s32 (!%p172_p11), %s733_s15, %s737_s16  ;;  %s524_s9 = sshll.u32 (!%p172_p11), %s197_s7, 5 }
  0x18   : > { %s866_s6 = scalar_select %p114_p12, %s729_s14, %s116_s5  }
  0x19   : > { %p201_p13 = scmp.lt.s32.totalorder (!%p172_p11), %s741_s17, 1  ;;  %p203_p0 = scmp.lt.s32.totalorder (!%p172_p11), %s200_s8, 33 }
  0x1a   : > { %s984_s0 = sld [smem:[#allocation6_spill]]  ;;  %s878_s26 = scalar_lea.vmem [#allocation2], %s524_s9 }
  0x1b   : > { %s202_s10 = scalar_select %p201_p13, %s741_s17, 1 }
  0x1c   : > { %s1006_s8 = smov (!%p203_p0, %s200_s8), 33  ;;  %p526_p1 = scmp.ne.s32.totalorder %s733_s15, 0 }
  0x1d   : > { %s554_s11 = smul.u32 170, %s202_s10 }
  0x1e   : > { %s553_s22 = smul.u32 5, %s1006_s8 }
  0x1f   : > { %215 = sbr.rel (%p526_p1) target bundleno = 41 (0x29), region = 36 }
  0x20   : > { %s207_s23 = sadd.s32 %s554_s11, %s553_s22 }
  0x21   : > { %s525_s29 = sshll.u32 %s207_s23, 2 }
  0x22   : > { %s209_s5 = scalar_lea.vmem %s984_s0, %s525_s29 }
  0x24   : > { %vm216_vm0 = vcmask 523264   ;;  %v759_v0 = vmov 0.0  }
  0x25   : > { %217 = vst.msk [vmem:[%s878_s26] sm:$0xff] %vm216_vm0, %v759_v0 }
  0x26   : > { %218 = vst.msk [vmem:[%s878_s26 + $0x8] sm:$0xff] %vm216_vm0, %v759_v0 }
  0x27   : > { %219 = vst.msk [vmem:[%s878_s26 + $0x10] sm:$0xff] %vm216_vm0, %v759_v0 }
  0x28   : > { %220 = vst.msk [vmem:[%s878_s26 + $0x18] sm:$0xff] %vm216_vm0, %v759_v0 }
  0x29 PF: > { %s230_s8 = smul.u32 3, %s733_s15  ;;  %vm250_vm1 = vcmask 1040384   ;;  %v550_v1 = vld [vmem:[%s209_s5] sm:$0xff]  ;;  %v551_v2 = vld [vmem:[%s209_s5 + $0x8] sm:$0xff]  ;;  %v760_v3 = vmov 0   ;;  %vm339_vm2 = vcmask 1046528  }
  0x2a   : > { %v252_v4 = vsel %vm250_vm1, 65535, %v760_v3  ;;  %v340_v5 = vrot.slane %v550_v1, 1  ;;  %v341_v6 = vrot.slane %v551_v2, 1  ;;  %v286_v7 = vshrl.u32 %v550_v1, 16  ;;  %v225_v15 = vld [vmem:[%s209_s5 + $0x10] sm:$0x1] }
  0x2b   : > { %s231_s11 = scalar_lea.vmem %s976_s1, %s230_s8  ;;  %v288_v8 = vshll.u32 %v550_v1, 16  ;;  %v292_v17 = vshll.u32 %v551_v2, 16  ;;  %vm243_vm3 = vcmask 7168   ;;  %vm285_vm4 = vsmask.f32 7424  ;;  %p543_p2 = scmp.ne.s32.totalorder %s733_s15, 2 }
  0x2c   : > { %v232_v9 = vld [vmem:[%s231_s11] sm:$0x1]  ;;  %v540_v10 = vld [vmem:[%s231_s11 + $0x2] sm:$0x1]  ;;  %v537_v11 = vld [vmem:[%s231_s11 + $0x1] sm:$0x1]  ;;  %v342_v18 = vsel %vm339_vm2, %v340_v5, %v341_v6  ;;  %v283_v21 = vunpack.c.l.b16 %v225_v15 }
  0x2d   : > { %v254_v12 = vand.u32 %v252_v4, %v232_v9  ;;  %v352_v13 = vand.u32 %v540_v10, %v252_v4  ;;  %v311_v14 = vand.u32 %v537_v11, %v252_v4  ;;  %v290_v16 = vrot.slane %v288_v8, 1  ;;  %v226_v31 = vld [vmem:[%s878_s26] sm:$0xff]  ;;  %v227_v37 = vld [vmem:[%s878_s26 + $0x8] sm:$0xff] }
  0x2e   : > { %v294_v20 = vrot.slane %v292_v17, 1  ;;  %v284_v23 = vpack.c.b16 %v283_v21, %v283_v21  ;;  %v296_v24 = vshrl.u32 %v551_v2, 16  ;;  %vm377_vm5 = vcmask 523264   ;;  %v228_v42 = vld [vmem:[%s878_s26 + $0x10] sm:$0xff] }
  0x2f   : > { %263 = vmatpush.bf16.msra.mxu0 %v254_v12  ;;  %361 = vmatpush.bf16.msra.mxu2 %v352_v13  ;;  %v291_v19 = vor.u32 %v290_v16, %v286_v7  ;;  %v229_v52 = vld [vmem:[%s878_s26 + $0x18] sm:$0xff] }
  0x30   : > { %320 = vmatpush.bf16.msra.mxu1 %v311_v14  ;;  %552 = vmatpush.bf16.msra.mxu3 %v254_v12  ;;  %v300_v25 = vshll.u32 %v284_v23, 16  ;;  %v343_v26 = vrot.slane %v284_v23, 1  ;;  %v298_v27 = vor.u32 %v296_v24, %v294_v20 }
  0x31   : > { %v295_v22 = vsel %vm285_vm4, %v291_v19, %v294_v20 }
  0x32   : > { %535 = vmatmul.msk.bf16.vlgmr.msra.gmra.mxu0 %vm243_vm3, %v550_v1  ;;  %541 = vmatmul.msk.bf16.vlgmr.msra.gmra.mxu2 %vm243_vm3, %v342_v18  ;;  %v302_v28 = vrot.slane %v300_v25, 1  ;;  %v344_v29 = vsel %vm339_vm2, %v341_v6, %v343_v26 }
  0x33   : > { %538 = vmatmul.msk.bf16.vlgmr.msra.gmra.mxu1 %vm243_vm3, %v295_v22  ;;  %536 = vmatmul.msk.bf16.vlgmr.msra.gmra.mxu3 %vm243_vm3, %v551_v2 }
  0x34   : > { %v303_v30 = vsel %vm285_vm4, %v298_v27, %v302_v28 }
  0x42   : > { %542 = vmatmul.msk.bf16.gmra.mxu2 %vm243_vm3, %v344_v29 }
  0x43   : > { %539 = vmatmul.msk.bf16.gmra.mxu1 %vm243_vm3, %v303_v30 }
  0xaf   : > { %v265_v32 = vpop.f32.mrf.mxu0 }
  0xb0   : > { %v275_v33 = vadd.f32 %v265_v32, %v226_v31  ;;  %v322_v34 = vpop.f32.mrf.mxu1 }
  0xb2   : > { %v332_v35 = vadd.f32 %v322_v34, %v275_v33 }
  0xb5   : > { %v363_v36 = vpop.f32.mrf.mxu2 }
  0xb6   : > { %v373_v38 = vadd.f32 %v363_v36, %v332_v35  ;;  %v270_v44 = vpop.f32.mrf.mxu3 }
  0xb7   : > { %v267_v39 = vpop.f32.mrf.mxu0  ;;  %v277_v46 = vadd.f32 %v270_v44, %v228_v42 }
  0xb8   : > { %378 = vst.msk [vmem:[%s878_s26] sm:$0xff] %vm377_vm5, %v373_v38  ;;  %v276_v40 = vadd.f32 %v267_v39, %v227_v37  ;;  %v324_v41 = vpop.f32.mrf.mxu1 }
  0xba   : > { %v333_v43 = vadd.f32 %v324_v41, %v276_v40 }
  0xbd   : > { %v365_v45 = vpop.f32.mrf.mxu2 }
  0xbe   : > { %v374_v47 = vadd.f32 %v365_v45, %v333_v43  ;;  %v272_v53 = vpop.f32.mrf.mxu3 }
  0xbf   : > { %v278_v55 = vadd.f32 %v272_v53, %v229_v52 }
  0xc0   : > { %379 = vst.msk [vmem:[%s878_s26 + $0x8] sm:$0xff] %vm377_vm5, %v374_v47  ;;  %v327_v48 = vpop.f32.mrf.mxu1 }
  0xc1   : > { %v334_v49 = vadd.f32 %v327_v48, %v277_v46 }
  0xc5   : > { %v368_v50 = vpop.f32.mrf.mxu2 }
  0xc6   : > { %v375_v51 = vadd.f32 %v368_v50, %v334_v49 }
  0xc8   : > { %380 = vst.msk [vmem:[%s878_s26 + $0x10] sm:$0xff] %vm377_vm5, %v375_v51  ;;  %v329_v54 = vpop.f32.mrf.mxu1 }
  0xc9   : > { %v335_v56 = vadd.f32 %v329_v54, %v278_v55 }
  0xcc   : > { %385 = sbr.rel (%p543_p2) target bundleno = 218 (0xda), region = 40 }
  0xcd   : > { %v370_v57 = vpop.f32.mrf.mxu2 }
  0xce   : > { %v376_v58 = vadd.f32 %v370_v57, %v335_v56 }
  0xd0   : > { %381 = vst.msk [vmem:[%s878_s26 + $0x18] sm:$0xff] %vm377_vm5, %v376_v58 }
  0xd1   : > { %v646_v59 = vld [vmem:[%s977_s2] ss:$0 sm:$0xff] }
  0xd2   : > { %v390_v60 = vadd.f32 %v646_v59, %v373_v38  ;;  %v391_v61 = vadd.f32 %v646_v59, %v374_v47  ;;  %v392_v62 = vadd.f32 %v646_v59, %v375_v51  ;;  %v393_v63 = vadd.f32 %v646_v59, %v376_v58 }
  0xd4   : > { %v394_v0 = vmax.f32 %v390_v60, 0.0  ;;  %v395_v1 = vmax.f32 %v391_v61, 0.0  ;;  %v396_v2 = vmax.f32 %v392_v62, 0.0  ;;  %v397_v3 = vmax.f32 %v393_v63, 0.0 }
  0xd6   : > { %398 = vst.msk [vmem:[%s878_s26] sm:$0xff] %vm377_vm5, %v394_v0 }
  0xd7   : > { %399 = vst.msk [vmem:[%s878_s26 + $0x8] sm:$0xff] %vm377_vm5, %v395_v1 }
  0xd8   : > { %400 = vst.msk [vmem:[%s878_s26 + $0x10] sm:$0xff] %vm377_vm5, %v396_v2 }
  0xd9   : > { %401 = vst.msk [vmem:[%s878_s26 + $0x18] sm:$0xff] %vm377_vm5, %v397_v3 }
  0xda PF: > { %s545_s15 = sshll.u32 %s737_s16, 2  ;;  %s546_s29 = sshll.u32 %s741_s17, 7 }
  0xdb   : > { %s417_s30 = sshll.u32 %s878_s26, 4  ;;  %s414_s4 = sadd.s32 %s546_s29, %s545_s15  ;;  %s418_s30 = int_to_ptr.vmem [resolvable:$true] %s417_s30 }
  0xdc   : > { %s547_s5 = sshll.u32 %s414_s4, 3  ;;  %s403_s22 = scalar_lea.sflag [#allocation3], %s197_s7 }
  0xdd   : > { %s416_s10 = scalar_lea.hbm %s978_s3, %s547_s5  ;;  %s667_s26 = scalar_lea.hbm %s978_s3, 2048 }
  0xde   : > { %s419_s11 = sshll.u32 %s416_s10, 4  ;;  %s420_s11 = int_to_ptr.hbm [resolvable:$true] %s419_s11 }
  0xdf   : > { %s661_s23 = sshra.s32 %s420_s11, 4  ;;  %s662_s23 = int_to_ptr.hbm [resolvable:$true] %s661_s23 }
  0xe0   : > { %s663_s0 = scalar_lea.hbm %s662_s23, 32  ;;  %p668_p8 = scmp.lt.s32.totalorder %s662_s23, %s978_s3 }
  0xe1   : > { %p664_p3 = scmp.ne.s32.totalorder %s662_s23, %s663_s0  ;;  %p669_p9 = scmp.lt.s32.totalorder %s667_s26, %s663_s0 }
  0xe3   : > { %p665_p4 = pnand %p664_p3, %p845_p6  ;;  %p670_p10 = por %p669_p9, %p668_p8 }
  0xe5   : > { %p666_p5 = pneg %p665_p4 }
  0xe7   : > { %p671_p11 = pnand %p670_p10, %p666_p5 }
  0xe9   : > { %674 = shalt.err (!%p671_p11)
}
  0xea   : > { %s761_s7 = smov 128   ;;  %s762_s4 = smov 8  }
  0xeb   : > { %555 = dma.vmem_to_hbm [thread:$0]  (%p845_p6), %s418_s30, 512, %s420_s11, %s403_s22, %s761_s7, %s761_s7, %s762_s4  }
  0xec PF: > { %p561_p12 = scmp.ge.s32.totalorder %s757_s21, 2  ;;  %s434_s5 = sand.u32 1, %s721_s12  }
  0xed   : > { %s435_s8 = scalar_lea.sflag [#allocation3], %s434_s5 }
  0xee   : > { %p558_p13 = pnand %p561_p12, %p852_p7 }
  0xf0   : > { %p559_p0 = pneg %p558_p13 }
  0xf2   : > { %716 = dma.done.wait (%p559_p0), %s435_s8, 512  }
  0xf3   : > { %718 = vsyncadd (%p559_p0), %s435_s8, 4294966784  ;;  %s16_s21 = sadd.s32 1, %s757_s21   ;;  %s985_s0 = sld [smem:[#allocation5_spill]] }
  0xf4   : > { %p13_p1 = scmp.ge.s32.totalorder %s16_s21, 194   ;;  %s986_s12 = smov %s725_s13 }
  0xf5   : > { %s987_s13 = smov %s729_s14  ;;  %s988_s14 = smov %s866_s6 }
  0xf6   : > { %s989_s15 = smov %s745_s18  ;;  %s990_s16 = smov %s749_s19 }
  0xf7   : > { %s991_s17 = smov %s753_s20  ;;  %s992_s18 = smov %s996_s24 }
  0xf8   : > { %s993_s19 = smov %s1000_s25  ;;  %15 = sbr.rel (!%p13_p1) target bundleno = 8 (0x8), region = 78 }
  0xf9   : > { %s994_s20 = smov %s985_s0 }
  0xfd   :  { %441 = vsyncpa [#allocation3], 1 }
  0xfe   :  { %443 = vsyncpa [#allocation3 + $0x1], 1 }

</bundles_post_ra>
